<compile_context>
chip_gen: v7x
topology: tpu7x:2x2x1
jax: 0.10.0
libtpu: 0.0.40
codegen_flags: <defaults>
</compile_context>

<pallas_src>
import functools

import jax
import jax.numpy as jnp
from jax.experimental import pallas as pl
from jax.experimental.pallas import tpu as pltpu

EPS = 1e-5
K = 3
KK = K * K
PAD_L = 8          # left halo column offset in the tail scratch (sublane aligned)


# ---------------------------------------------------------------------------
# Kernel 1: fused 1x1-conv chain, tiled over M = B*H*W rows
# ---------------------------------------------------------------------------
def head_kernel(x_ref, w1_ref, s1_ref, o1_ref, wi1_ref, si_ref, oi_ref,
                wi2_ref, bi2_ref, res_ref, t_ref, kern_ref):
    # conv1 (1x1) + folded bn1 ; residual is taken PRE-ReLU
    y1 = jnp.dot(x_ref[...], w1_ref[...], preferred_element_type=jnp.float32)
    res = y1 * s1_ref[...] + o1_ref[...]
    t = jnp.maximum(res, 0.0)

    # involution reduce conv (1x1 + bias) + folded bn + relu
    red = jnp.dot(t.astype(jnp.bfloat16), wi1_ref[...],
                  preferred_element_type=jnp.float32)
    red = jnp.maximum(red * si_ref[...] + oi_ref[...], 0.0)

    # involution span conv (1x1 + bias) -> per-pixel kernels (G*KK channels)
    kern = jnp.dot(red.astype(jnp.bfloat16), wi2_ref[...],
                   preferred_element_type=jnp.float32) + bi2_ref[...]

    res_ref[...] = res.astype(res_ref.dtype)
    t_ref[...] = t.astype(t_ref.dtype)
    kern_ref[...] = kern.astype(kern_ref.dtype)


def fused_head(xf, w1t, s1, o1, wi1t, si, oi, wi2t, bi2, *, preferred_tile_m=1024):
    M, Cin = xf.shape
    Cout = w1t.shape[1]
    Cmid = wi1t.shape[1]
    GKK = wi2t.shape[1]

    # tile over rows; prefer >= 2 grid steps so v7x can split across its 2 TCs
    tm = min(preferred_tile_m, M)
    if tm == M and M % 16 == 0:
        tm = M // 2
    grid = (pl.cdiv(M, tm),)

    row = lambda i: (i, 0)
    rep = lambda i: (0, 0)

    flops = 2 * M * (Cin * Cout + Cout * Cmid + Cmid * GKK)
    bytes_accessed = (2 * M * Cin                               # bf16 input
                      + 4 * M * (2 * Cout + GKK)                # f32 outputs
                      + 2 * (Cin * Cout + Cout * Cmid + Cmid * GKK)
                      + 4 * (2 * Cout + 2 * Cmid + GKK))

    return pl.pallas_call(
        head_kernel,
        out_shape=(jax.ShapeDtypeStruct((M, Cout), jnp.float32),   # res
                   jax.ShapeDtypeStruct((M, Cout), jnp.float32),   # t = relu(res)
                   jax.ShapeDtypeStruct((M, GKK), jnp.float32)),   # per-pixel kernels
        grid=grid,
        in_specs=[pl.BlockSpec((tm, Cin), row),
                  pl.BlockSpec((Cin, Cout), rep),
                  pl.BlockSpec((1, Cout), rep),
                  pl.BlockSpec((1, Cout), rep),
                  pl.BlockSpec((Cout, Cmid), rep),
                  pl.BlockSpec((1, Cmid), rep),
                  pl.BlockSpec((1, Cmid), rep),
                  pl.BlockSpec((Cmid, GKK), rep),
                  pl.BlockSpec((1, GKK), rep)],
        out_specs=(pl.BlockSpec((tm, Cout), row),
                   pl.BlockSpec((tm, Cout), row),
                   pl.BlockSpec((tm, GKK), row)),
        compiler_params=pltpu.CompilerParams(dimension_semantics=("parallel",)),
        cost_estimate=pl.CostEstimate(flops=flops, transcendentals=0,
                                      bytes_accessed=bytes_accessed),
    )(xf, w1t, s1.reshape(1, -1), o1.reshape(1, -1), wi1t,
      si.reshape(1, -1), oi.reshape(1, -1), wi2t, bi2.reshape(1, -1))


# ---------------------------------------------------------------------------
# Kernel 2: involution aggregation + bn2 + relu + conv3 + bn3 + residual + relu
# ---------------------------------------------------------------------------
def involution_tail_kernel(t_ref, kern_ref, res_ref, w3_ref,
                           s2_ref, o2_ref, s3_ref, o3_ref,
                           o_ref, pad_ref, *, groups):
    _, H, W, C = o_ref.shape
    GC = C // groups

    # Build the 1-pixel zero halo in VMEM (no HBM jnp.pad).  The activation is
    # stored at a sublane-aligned column offset PAD_L; the 3x3 taps read windows
    # starting at columns PAD_L-1+kw.
    pad_ref[...] = jnp.zeros_like(pad_ref)
    pad_ref[1:H + 1, PAD_L:PAD_L + W, :] = t_ref[0]

    # lane -> group-index mask; used to expand the per-group per-pixel kernel
    # across its GC group-channels in-register (kern_full is never materialized).
    cidx = jax.lax.broadcasted_iota(jnp.int32, (1, 1, C), 2)

    acc = jnp.zeros((H, W, C), jnp.float32)
    for k in range(KK):
        kh, kw = k // K, k % K
        patch = pad_ref[kh:kh + H, PAD_L - 1 + kw:PAD_L - 1 + kw + W, :]
        wk = kern_ref[0, :, :, k:k + 1]                      # group 0: (H, W, 1)
        for g in range(1, groups):
            wk = jnp.where(cidx >= g * GC,
                           kern_ref[0, :, :, g * KK + k:g * KK + k + 1], wk)
        acc = acc + patch * wk

    # bn2 + relu
    u = jnp.maximum(acc * s2_ref[...].reshape(1, 1, C)
                    + o2_ref[...].reshape(1, 1, C), 0.0)

    # conv3 (resident C x C weight) + bn3 + residual + relu
    y = jnp.dot(u.reshape(H * W, C).astype(jnp.bfloat16), w3_ref[...],
                preferred_element_type=jnp.float32)
    y = y * s3_ref[...] + o3_ref[...]
    y = y.reshape(H, W, C) + res_ref[0]
    o_ref[0] = jnp.maximum(y, 0.0).astype(o_ref.dtype)


def involution_tail(t_map, kern, res_map, w3t, s2, o2, s3, o3, *, groups):
    B, H, W, C = t_map.shape
    GKK = kern.shape[-1]

    img = lambda b: (b, 0, 0, 0)
    rep = lambda b: (0, 0)

    flops = B * H * W * (2 * KK * C + 2 * C * C + 8 * C)
    bytes_accessed = 4 * B * H * W * (3 * C + GKK) + 2 * C * C + 4 * 4 * C

    return pl.pallas_call(
        functools.partial(involution_tail_kernel, groups=groups),
        out_shape=jax.ShapeDtypeStruct((B, H, W, C), jnp.float32),
        grid=(B,),
        in_specs=[pl.BlockSpec((1, H, W, C), img),
                  pl.BlockSpec((1, H, W, GKK), img),
                  pl.BlockSpec((1, H, W, C), img),
                  pl.BlockSpec((C, C), rep),
                  pl.BlockSpec((1, C), rep),
                  pl.BlockSpec((1, C), rep),
                  pl.BlockSpec((1, C), rep),
                  pl.BlockSpec((1, C), rep)],
        out_specs=pl.BlockSpec((1, H, W, C), img),
        scratch_shapes=[pltpu.VMEM((H + 2, W + 2 * PAD_L, C), jnp.float32)],
        compiler_params=pltpu.CompilerParams(
            dimension_semantics=("parallel",),
            vmem_limit_bytes=64 * 1024 * 1024),
        cost_estimate=pl.CostEstimate(flops=flops, transcendentals=0,
                                      bytes_accessed=bytes_accessed),
    )(t_map, kern, res_map, w3t,
      s2.reshape(1, -1), o2.reshape(1, -1), s3.reshape(1, -1), o3.reshape(1, -1))


# ---------------------------------------------------------------------------
# ExBlock forward
# ---------------------------------------------------------------------------
def fold_bn(g, b, m, v, conv_bias=None):
    scale = g / jnp.sqrt(v + EPS)
    off = b - m * scale
    if conv_bias is not None:
        off = off + conv_bias * scale
    return scale, off


def exblock_forward(P, x_nchw):
    x = jnp.transpose(x_nchw, (0, 2, 3, 1)).astype(jnp.float32)      # -> NHWC
    B, H, W, Cin = x.shape
    Cout = P["W1"].shape[0]
    G = P["groups"]
    GKK = KK * G
    M = B * H * W

    s1, o1 = fold_bn(P["bn1_g"], P["bn1_b"], P["bn1_m"], P["bn1_v"])
    si, oi = fold_bn(P["bni_g"], P["bni_b"], P["bni_m"], P["bni_v"], P["bi1"])
    s2, o2 = fold_bn(P["bn2_g"], P["bn2_b"], P["bn2_m"], P["bn2_v"])
    s3, o3 = fold_bn(P["bn3_g"], P["bn3_b"], P["bn3_m"], P["bn3_v"])

    bf = jnp.bfloat16
    res, t, kern = fused_head(
        x.reshape(M, Cin).astype(bf),
        P["W1"].T.astype(bf), s1, o1,
        P["Wi1"].T.astype(bf), si, oi,
        P["Wi2"].T.astype(bf), P["bi2"])

    out = involution_tail(
        t.reshape(B, H, W, Cout),
        kern.reshape(B, H, W, GKK),
        res.reshape(B, H, W, Cout),
        P["W3"].T.astype(bf), s2, o2, s3, o3, groups=G)

    return jnp.transpose(out, (0, 3, 1, 2))                          # -> NCHW


# ---------------------------------------------------------------------------
# Pure-jnp reference (unfolded BN math, same bf16-operand / f32-acc matmuls)
# ---------------------------------------------------------------------------
def ref_forward(P, x_nchw):
    x = jnp.transpose(x_nchw, (0, 2, 3, 1)).astype(jnp.float32)
    Cout = P["W1"].shape[0]
    G = P["groups"]
    GC = Cout // G

    def mm(a, w):   # 1x1 conv: bf16 operands, f32 accumulation (matches kernels)
        return jnp.einsum("...k,ok->...o", a.astype(jnp.bfloat16),
                          w.astype(jnp.bfloat16),
                          preferred_element_type=jnp.float32)

    def bn(y, pfx):
        g, b, m, v = P[pfx + "_g"], P[pfx + "_b"], P[pfx + "_m"], P[pfx + "_v"]
        return (y - m) / jnp.sqrt(v + EPS) * g + b

    out = bn(mm(x, P["W1"]), "bn1")
    residual = out
    out = jax.nn.relu(out)

    red = jax.nn.relu(bn(mm(out, P["Wi1"]) + P["bi1"], "bni"))
    kern = mm(red, P["Wi2"]) + P["bi2"]
    B, H, W, _ = kern.shape
    kern = kern.reshape(B, H, W, G, KK)

    xpad = jnp.pad(out, ((0, 0), (1, 1), (1, 1), (0, 0)))
    acc = jnp.zeros((B, H, W, G, GC), jnp.float32)
    for kh in range(K):
        for kw in range(K):
            k = kh * K + kw
            patch = xpad[:, kh:kh + H, kw:kw + W, :].reshape(B, H, W, G, GC)
            acc = acc + patch * kern[..., k][..., None]
    out = acc.reshape(B, H, W, Cout)
    out = jax.nn.relu(bn(out, "bn2"))
    out = bn(mm(out, P["W3"]), "bn3") + residual
    out = jax.nn.relu(out)
    return jnp.transpose(out, (0, 3, 1, 2))


# ---------------------------------------------------------------------------
# Deterministic parameter initialization
# ---------------------------------------------------------------------------
def init_params(key, in_channels, out_channels, group_channels=16, reduction=4):
    assert out_channels % group_channels == 0
    groups = out_channels // group_channels
    cmid = out_channels // reduction
    keys = jax.random.split(key, 24)
    ki = iter(keys)

    def w(shape, fan_in):
        return jax.random.normal(next(ki), shape, jnp.float32) / jnp.sqrt(fan_in)

    def bn_params(c):
        return dict(
            g=1.0 + 0.1 * jax.random.normal(next(ki), (c,), jnp.float32),
            b=0.1 * jax.random.normal(next(ki), (c,), jnp.float32),
            m=0.1 * jax.random.normal(next(ki), (c,), jnp.float32),
            v=jax.random.uniform(next(ki), (c,), jnp.float32, 0.5, 1.5),
        )

    P = {"groups": groups}
    P["W1"] = w((out_channels, in_channels), in_channels)            # conv1 1x1
    for name, c in [("bn1", out_channels), ("bni", cmid),
                    ("bn2", out_channels), ("bn3", out_channels)]:
        bp = bn_params(c)
        for k_, v_ in bp.items():
            P[f"{name}_{k_}"] = v_
    P["Wi1"] = w((cmid, out_channels), out_channels)                 # involution reduce
    P["bi1"] = 0.1 * jax.random.normal(next(ki), (cmid,), jnp.float32)
    P["Wi2"] = w((KK * groups, cmid), cmid)                          # involution span
    P["bi2"] = 0.1 * jax.random.normal(next(ki), (KK * groups,), jnp.float32)
    P["W3"] = w((out_channels, out_channels), out_channels)          # conv3 1x1
    return P


# ---------------------------------------------------------------------------
if __name__ == "__main__":
    B, Cin, Cout, H, W = 2, 8, 32, 16, 16
    key = jax.random.PRNGKey(0)
    kx, kp = jax.random.split(key)
    x = jax.random.normal(kx, (B, Cin, H, W), jnp.float32)   # NCHW like PyTorch
    P = init_params(kp, Cin, Cout)

    out = jax.block_until_ready(exblock_forward(P, x))
    ref = jax.block_until_ready(ref_forward(P, x))

    assert out.shape == (B, Cout, H, W), out.shape
    max_err = float(jnp.max(jnp.abs(out - ref)))
    assert jnp.allclose(out, ref, rtol=1e-2, atol=1e-2), max_err
    print("KERNEL_OK")
</pallas_src>

<mosaic_0001>
module attributes {stable_mosaic.version = 11 : i64} {
  func.func @head_kernel(%arg0: i32, %arg1: memref<256x8xbf16, #tpu.memory_space<vmem>>, %arg2: memref<8x32xbf16, #tpu.memory_space<vmem>>, %arg3: memref<1x32xf32, #tpu.memory_space<vmem>>, %arg4: memref<1x32xf32, #tpu.memory_space<vmem>>, %arg5: memref<32x8xbf16, #tpu.memory_space<vmem>>, %arg6: memref<1x8xf32, #tpu.memory_space<vmem>>, %arg7: memref<1x8xf32, #tpu.memory_space<vmem>>, %arg8: memref<8x18xbf16, #tpu.memory_space<vmem>>, %arg9: memref<1x18xf32, #tpu.memory_space<vmem>>, %arg10: memref<256x32xf32, #tpu.memory_space<vmem>>, %arg11: memref<256x32xf32, #tpu.memory_space<vmem>>, %arg12: memref<256x18xf32, #tpu.memory_space<vmem>>) attributes {dimension_semantics = [#tpu.dimension_semantics<parallel>], iteration_bounds = array<i64: 2>, scalar_prefetch = 0 : i64, scratch_operands = 0 : i64, tpu.core_type = #tpu.core_type<tc>, window_params = [{transform_indices = @transform_0, window_bounds = array<i64: 256, 8>}, {pipeline_mode = #tpu.pipeline_mode<synchronous>, transform_indices = @transform_1, window_bounds = array<i64: 8, 32>}, {pipeline_mode = #tpu.pipeline_mode<synchronous>, transform_indices = @transform_2, window_bounds = array<i64: 1, 32>}, {pipeline_mode = #tpu.pipeline_mode<synchronous>, transform_indices = @transform_3, window_bounds = array<i64: 1, 32>}, {pipeline_mode = #tpu.pipeline_mode<synchronous>, transform_indices = @transform_4, window_bounds = array<i64: 32, 8>}, {pipeline_mode = #tpu.pipeline_mode<synchronous>, transform_indices = @transform_5, window_bounds = array<i64: 1, 8>}, {pipeline_mode = #tpu.pipeline_mode<synchronous>, transform_indices = @transform_6, window_bounds = array<i64: 1, 8>}, {pipeline_mode = #tpu.pipeline_mode<synchronous>, transform_indices = @transform_7, window_bounds = array<i64: 8, 18>}, {pipeline_mode = #tpu.pipeline_mode<synchronous>, transform_indices = @transform_8, window_bounds = array<i64: 1, 18>}, {transform_indices = @transform_9, window_bounds = array<i64: 256, 32>}, {transform_indices = @transform_10, window_bounds = array<i64: 256, 32>}, {transform_indices = @transform_11, window_bounds = array<i64: 256, 18>}]} {
    %c0 = arith.constant 0 : index
    %c0_0 = arith.constant 0 : index
    %0 = vector.load %arg1[%c0, %c0_0] : memref<256x8xbf16, #tpu.memory_space<vmem>>, vector<256x8xbf16>
    %c0_1 = arith.constant 0 : index
    %c0_2 = arith.constant 0 : index
    %1 = vector.load %arg2[%c0_1, %c0_2] : memref<8x32xbf16, #tpu.memory_space<vmem>>, vector<8x32xbf16>
    %cst = arith.constant dense<0.000000e+00> : vector<256x32xf32>
    %2 = tpu.matmul %0, %1, %cst {dimension_numbers = #tpu.dot_dimension_numbers<[1], [0], [0], [1], [0, 0, 1, 1], [], []>} : vector<256x8xbf16>, vector<8x32xbf16>, vector<256x32xf32> -> vector<256x32xf32>
    %c0_3 = arith.constant 0 : index
    %c0_4 = arith.constant 0 : index
    %3 = vector.load %arg3[%c0_3, %c0_4] : memref<1x32xf32, #tpu.memory_space<vmem>>, vector<1x32xf32>
    %4 = vector.broadcast %3 : vector<1x32xf32> to vector<256x32xf32>
    %5 = arith.mulf %2, %4 : vector<256x32xf32>
    %c0_5 = arith.constant 0 : index
    %c0_6 = arith.constant 0 : index
    %6 = vector.load %arg4[%c0_5, %c0_6] : memref<1x32xf32, #tpu.memory_space<vmem>>, vector<1x32xf32>
    %7 = vector.broadcast %6 : vector<1x32xf32> to vector<256x32xf32>
    %8 = arith.addf %5, %7 : vector<256x32xf32>
    %cst_7 = arith.constant 0.000000e+00 : f32
    %9 = vector.broadcast %cst_7 : f32 to vector<256x32xf32>
    %10 = arith.maximumf %8, %9 : vector<256x32xf32>
    %11 = arith.truncf %10 : vector<256x32xf32> to vector<256x32xbf16>
    %c0_8 = arith.constant 0 : index
    %c0_9 = arith.constant 0 : index
    %12 = vector.load %arg5[%c0_8, %c0_9] : memref<32x8xbf16, #tpu.memory_space<vmem>>, vector<32x8xbf16>
    %cst_10 = arith.constant dense<0.000000e+00> : vector<256x8xf32>
    %13 = tpu.matmul %11, %12, %cst_10 {dimension_numbers = #tpu.dot_dimension_numbers<[1], [0], [0], [1], [0, 0, 1, 1], [], []>} : vector<256x32xbf16>, vector<32x8xbf16>, vector<256x8xf32> -> vector<256x8xf32>
    %c0_11 = arith.constant 0 : index
    %c0_12 = arith.constant 0 : index
    %14 = vector.load %arg6[%c0_11, %c0_12] : memref<1x8xf32, #tpu.memory_space<vmem>>, vector<1x8xf32>
    %15 = vector.broadcast %14 : vector<1x8xf32> to vector<256x8xf32>
    %16 = arith.mulf %13, %15 : vector<256x8xf32>
    %c0_13 = arith.constant 0 : index
    %c0_14 = arith.constant 0 : index
    %17 = vector.load %arg7[%c0_13, %c0_14] : memref<1x8xf32, #tpu.memory_space<vmem>>, vector<1x8xf32>
    %18 = vector.broadcast %17 : vector<1x8xf32> to vector<256x8xf32>
    %19 = arith.addf %16, %18 : vector<256x8xf32>
    %cst_15 = arith.constant 0.000000e+00 : f32
    %20 = vector.broadcast %cst_15 : f32 to vector<256x8xf32>
    %21 = arith.maximumf %19, %20 : vector<256x8xf32>
    %22 = arith.truncf %21 : vector<256x8xf32> to vector<256x8xbf16>
    %c0_16 = arith.constant 0 : index
    %c0_17 = arith.constant 0 : index
    %23 = vector.load %arg8[%c0_16, %c0_17] : memref<8x18xbf16, #tpu.memory_space<vmem>>, vector<8x18xbf16>
    %cst_18 = arith.constant dense<0.000000e+00> : vector<256x18xf32>
    %24 = tpu.matmul %22, %23, %cst_18 {dimension_numbers = #tpu.dot_dimension_numbers<[1], [0], [0], [1], [0, 0, 1, 1], [], []>} : vector<256x8xbf16>, vector<8x18xbf16>, vector<256x18xf32> -> vector<256x18xf32>
    %c0_19 = arith.constant 0 : index
    %c0_20 = arith.constant 0 : index
    %25 = vector.load %arg9[%c0_19, %c0_20] : memref<1x18xf32, #tpu.memory_space<vmem>>, vector<1x18xf32>
    %26 = vector.broadcast %25 : vector<1x18xf32> to vector<256x18xf32>
    %27 = arith.addf %24, %26 : vector<256x18xf32>
    %c0_21 = arith.constant 0 : index
    %c0_22 = arith.constant 0 : index
    %28 = vector.load %arg10[%c0_21, %c0_22] : memref<256x32xf32, #tpu.memory_space<vmem>>, vector<256x32xf32>
    tpu.vector_store %arg10[%c0_21, %c0_22], %8 {strides = array<i32>} : memref<256x32xf32, #tpu.memory_space<vmem>>, vector<256x32xf32>,
    %c0_23 = arith.constant 0 : index
    %c0_24 = arith.constant 0 : index
    %29 = vector.load %arg11[%c0_23, %c0_24] : memref<256x32xf32, #tpu.memory_space<vmem>>, vector<256x32xf32>
    tpu.vector_store %arg11[%c0_23, %c0_24], %10 {strides = array<i32>} : memref<256x32xf32, #tpu.memory_space<vmem>>, vector<256x32xf32>,
    %c0_25 = arith.constant 0 : index
    %c0_26 = arith.constant 0 : index
    %30 = vector.load %arg12[%c0_25, %c0_26] : memref<256x18xf32, #tpu.memory_space<vmem>>, vector<256x18xf32>
    tpu.vector_store %arg12[%c0_25, %c0_26], %27 {strides = array<i32>} : memref<256x18xf32, #tpu.memory_space<vmem>>, vector<256x18xf32>,
    return
  }
  func.func @transform_0(%arg0: i32) -> (i32, i32) {
    %c0_i32 = arith.constant 0 : i32
    %c0_i32_0 = arith.constant 0 : i32
    return %arg0, %c0_i32 : i32, i32
  }
  func.func @transform_1(%arg0: i32) -> (i32, i32) {
    %c0_i32 = arith.constant 0 : i32
    %c0_i32_0 = arith.constant 0 : i32
    %c0_i32_1 = arith.constant 0 : i32
    return %c0_i32, %c0_i32_0 : i32, i32
  }
  func.func @transform_2(%arg0: i32) -> (i32, i32) {
    %c0_i32 = arith.constant 0 : i32
    %c0_i32_0 = arith.constant 0 : i32
    %c0_i32_1 = arith.constant 0 : i32
    return %c0_i32, %c0_i32_0 : i32, i32
  }
  func.func @transform_3(%arg0: i32) -> (i32, i32) {
    %c0_i32 = arith.constant 0 : i32
    %c0_i32_0 = arith.constant 0 : i32
    %c0_i32_1 = arith.constant 0 : i32
    return %c0_i32, %c0_i32_0 : i32, i32
  }
  func.func @transform_4(%arg0: i32) -> (i32, i32) {
    %c0_i32 = arith.constant 0 : i32
    %c0_i32_0 = arith.constant 0 : i32
    %c0_i32_1 = arith.constant 0 : i32
    return %c0_i32, %c0_i32_0 : i32, i32
  }
  func.func @transform_5(%arg0: i32) -> (i32, i32) {
    %c0_i32 = arith.constant 0 : i32
    %c0_i32_0 = arith.constant 0 : i32
    %c0_i32_1 = arith.constant 0 : i32
    return %c0_i32, %c0_i32_0 : i32, i32
  }
  func.func @transform_6(%arg0: i32) -> (i32, i32) {
    %c0_i32 = arith.constant 0 : i32
    %c0_i32_0 = arith.constant 0 : i32
    %c0_i32_1 = arith.constant 0 : i32
    return %c0_i32, %c0_i32_0 : i32, i32
  }
  func.func @transform_7(%arg0: i32) -> (i32, i32) {
    %c0_i32 = arith.constant 0 : i32
    %c0_i32_0 = arith.constant 0 : i32
    %c0_i32_1 = arith.constant 0 : i32
    return %c0_i32, %c0_i32_0 : i32, i32
  }
  func.func @transform_8(%arg0: i32) -> (i32, i32) {
    %c0_i32 = arith.constant 0 : i32
    %c0_i32_0 = arith.constant 0 : i32
    %c0_i32_1 = arith.constant 0 : i32
    return %c0_i32, %c0_i32_0 : i32, i32
  }
  func.func @transform_9(%arg0: i32) -> (i32, i32) {
    %c0_i32 = arith.constant 0 : i32
    %c0_i32_0 = arith.constant 0 : i32
    return %arg0, %c0_i32 : i32, i32
  }
  func.func @transform_10(%arg0: i32) -> (i32, i32) {
    %c0_i32 = arith.constant 0 : i32
    %c0_i32_0 = arith.constant 0 : i32
    return %arg0, %c0_i32 : i32, i32
  }
  func.func @transform_11(%arg0: i32) -> (i32, i32) {
    %c0_i32 = arith.constant 0 : i32
    %c0_i32_0 = arith.constant 0 : i32
    return %arg0, %c0_i32 : i32, i32
  }
}

</mosaic_0001>

<bundles_post_ra>
// kernel: tpu_custom_call.1
= control target key start
LH: loop header
LB: loop body
LE: loop exit
PB: predicated region body
PF: predicated region fallthrough
CT: control target
= control target key end

     0   :  { %s2005_s17 = smov 0   ;;  %s2515_s0 = inlined_call_operand.vmem [shape: bf16[512,8], index: 0, kind: input, shape index: {}]   ;;  %s2516_s1 = inlined_call_operand.vmem [shape: bf16[8,32], index: 1, kind: input, shape index: {}]   ;;  %s2517_s2 = inlined_call_operand.vmem [shape: f32[1,32], index: 2, kind: input, shape index: {}]   ;;  %s2518_s3 = inlined_call_operand.vmem [shape: f32[1,32], index: 3, kind: input, shape index: {}]   ;;  %s2519_s4 = inlined_call_operand.vmem [shape: bf16[32,8], index: 4, kind: input, shape index: {}]   ;;  %s2520_s5 = inlined_call_operand.vmem [shape: f32[1,8], index: 5, kind: input, shape index: {}]   ;;  %s2521_s6 = inlined_call_operand.vmem [shape: f32[1,8], index: 6, kind: input, shape index: {}]   ;;  %s2522_s7 = inlined_call_operand.vmem [shape: bf16[8,18], index: 7, kind: input, shape index: {}]   ;;  %s2523_s8 = inlined_call_operand.vmem [shape: f32[1,18], index: 8, kind: input, shape index: {}]   ;;  %s2524_s9 = inlined_call_operand.vmem [shape: f32[512,32], index: 9, kind: output, shape index: {0}]   ;;  %s2525_s10 = inlined_call_operand.vmem [shape: f32[512,32], index: 10, kind: output, shape index: {1}]   ;;  %s2526_s11 = inlined_call_operand.vmem [shape: f32[512,18], index: 11, kind: output, shape index: {2}]  }
   0x1 LB: > { %s1664_s18 = sadd.s32 4294967295, %s1943_s17   ;;  %p1668_p0 = scmp.ge.s32.totalorder %s1943_s17, 1  ;;  %s1943_s17 = sphi %s2005_s17, %s22_s17  }
   0x2   : > { %p343_p1 = scmp.lt.s32.totalorder %s1943_s17, 3 }
   0x4   : > { %p344_p2 = pnand %p1668_p0, %p343_p1 }
   0x5   : > { %v450_v0 = vld [vmem:[%s2516_s1] sm:$0xf] (!%p344_p2)  ;;  %vm580_vm0 = vcmask (!%p344_p2), 1043456   ;;  %s1669_s21 = sshll.u32 (!%p344_p2), %s1664_s18, 5  ;;  %vm531_vm1 = vcmask (!%p344_p2), 64512   ;;  %v1936_v9 = vld [vmem:[%s2519_s4 + $0x8] sm:$0xff] (!%p344_p2)  }
   0x6   : > { %347 = sbr.rel (%p344_p2) target bundleno = 740 (0x2e4), region = 56  ;;  %v1935_v1 = vld [vmem:[%s2519_s4] sm:$0xff] (!%p344_p2)   ;;  %1908 = vmatprep.subr.msk.bf16.mxu0 (!%p344_p2), %vm580_vm0, %v450_v0  ;;  %v582_v2 = vsel (!%p344_p2), %vm580_vm0, %v450_v0, 0  ;;  %p394_p3 = scmp.lt.s32.totalorder (!%p344_p2), %s1669_s21, 63  ;;  %1909 = vmatprep.subr.msk.bf16.mxu1 (!%p344_p2), %vm580_vm0, %v450_v0  ;;  %vm887_vm2 = vcmask (!%p344_p2), 261120   ;;  %vm1507_vm3 = vcmask (!%p344_p2), 146432  }
   0x7   : > { %1803 = vmatpush3.bf16.msra.mxu0 (!%p344_p2), %v582_v2  ;;  %1907 = vmatpush3.bf16.msra.mxu1 (!%p344_p2), %v582_v2  ;;  %v1223_v20 = vld [vmem:[%s2522_s7] sm:$0xf] (!%p344_p2) }
   0x8   : > { %1836 = vmatprep.subr.bf16.mxu1 (!%p344_p2), %v1935_v1  ;;  %1910 = vmatprep.subr.msk.bf16.mxu0 (!%p344_p2), %vm580_vm0, %v1223_v20  ;;  %v1280_v21 = vsel (!%p344_p2), %vm580_vm0, %v1223_v20, 0  ;;  %v2073_v22 = vld [vmem:[%s2517_s2] ss:$0 sm:$0xff] (!%p344_p2) }
   0x9   : > { %v2081_v24 = vld [vmem:[%s2518_s3] ss:$0 sm:$0xff] (!%p344_p2) }
   0xd   : > { %s2528_s21 = smov (!%p394_p3, %s1669_s21), 63 }
   0xe   : > { %s1670_s24 = sshll.u32 %s2528_s21, 2  ;;  %s2076_s15 = sshll.u32 %s2528_s21, 3 }
   0xf   : > { %s2028_s27 = scalar_lea.vmem %s2515_s0, %s1670_s24  ;;  %s2088_s22 = scalar_lea.vmem %s2524_s9, %s2076_s15 }
  0x10   : > { %v1919_v3 = vld [vmem:[%s2028_s27] sm:$0xff]   ;;  %v1920_v4 = vld [vmem:[%s2028_s27 + $0x8] sm:$0xff]   ;;  %v1921_v5 = vld [vmem:[%s2028_s27 + $0x10] sm:$0xff]   ;;  %s2097_s24 = scalar_lea.vmem %s2525_s10, %s2076_s15  ;;  %s2414_s14 = scalar_lea.vmem %s2526_s11, %s2076_s15 }
  0x11   : > { %1804 = vmatprep.mubr.msk.bf16.mxu0 %vm531_vm1, %v1919_v3  ;;  %v1922_v6 = vld [vmem:[%s2028_s27 + $0x18] sm:$0xff]   ;;  %v1923_v7 = vld [vmem:[%s2028_s27 + $0x20] sm:$0xff]   ;;  %v1928_v10 = vld [vmem:[%s2028_s27 + $0x48] sm:$0xff]  }
  0x12   : > { %1805 = vmatmul.mubr.msk.bf16.vlgmr.msra.gmra.mrb[0].mxu0 %vm531_vm1, %v1920_v4  ;;  %v1927_v8 = vld [vmem:[%s2028_s27 + $0x40] sm:$0xff]   ;;  %v1929_v11 = vld [vmem:[%s2028_s27 + $0x50] sm:$0xff]   ;;  %v1924_v12 = vld [vmem:[%s2028_s27 + $0x28] sm:$0xff]  }
  0x13   : > { %1808 = vmatprep.mubr.msk.bf16.mxu0 %vm531_vm1, %v1921_v5  ;;  %1820 = vmatprep.mubr.msk.bf16.mxu1 %vm531_vm1, %v1927_v8  ;;  %v1930_v13 = vld [vmem:[%s2028_s27 + $0x58] sm:$0xff]   ;;  %v1925_v14 = vld [vmem:[%s2028_s27 + $0x30] sm:$0xff]   ;;  %v1931_v15 = vld [vmem:[%s2028_s27 + $0x60] sm:$0xff]  }
  0x14   : > { %1821 = vmatmul.mubr.msk.bf16.vlgmr.msra.gmra.mrb[0].mxu1 %vm531_vm1, %v1928_v10  ;;  %v1926_v16 = vld [vmem:[%s2028_s27 + $0x38] sm:$0xff]   ;;  %v1932_v17 = vld [vmem:[%s2028_s27 + $0x68] sm:$0xff]   ;;  %v1933_v18 = vld [vmem:[%s2028_s27 + $0x70] sm:$0xff]   ;;  %1873 = vmatpush3.bf16.msra.mxu0 %v1280_v21 }
  0x15   : > { %1824 = vmatprep.mubr.msk.bf16.mxu1 %vm531_vm1, %v1929_v11  ;;  %1837 = vmatpush3.bf16.msra.mxu1 %v1935_v1  ;;  %v1934_v19 = vld [vmem:[%s2028_s27 + $0x78] sm:$0xff]  }
  0x16   : > { %1838 = vmatprep.subr.bf16.mxu1 %v1936_v9 }
  0x19   : > { %1839 = vmatpush3.bf16.msra.mxu1 %v1936_v9 }
  0x1a   : > { %1809 = vmatmul.mubr.msk.bf16.gmra.mrb[4].mxu0 %vm531_vm1, %v1922_v6 }
  0x1b   : > { %1812 = vmatprep.mubr.msk.bf16.mxu0 %vm531_vm1, %v1923_v7 }
  0x1c   : > { %1825 = vmatmul.mubr.msk.bf16.gmra.mrb[4].mxu1 %vm531_vm1, %v1930_v13 }
  0x1d   : > { %1828 = vmatprep.mubr.msk.bf16.mxu1 %vm531_vm1, %v1931_v15 }
  0x22   : > { %1813 = vmatmul.mubr.msk.bf16.gmra.mrb[8].mxu0 %vm531_vm1, %v1924_v12 }
  0x23   : > { %1816 = vmatprep.mubr.msk.bf16.mxu0 %vm531_vm1, %v1925_v14 }
  0x24   : > { %1829 = vmatmul.mubr.msk.bf16.gmra.mrb[8].mxu1 %vm531_vm1, %v1932_v17 }
  0x25   : > { %1832 = vmatprep.mubr.msk.bf16.mxu1 %vm531_vm1, %v1933_v18 }
  0x2a   : > { %1817 = vmatmul.mubr.msk.bf16.gmra.mrb[12].mxu0 %vm531_vm1, %v1926_v16 }
  0x2c   : > { %1833 = vmatmul.mubr.msk.bf16.gmra.mrb[12].mxu1 %vm531_vm1, %v1934_v19 }
  0xe5   : > { %v1806_v23 = vpop.f32.mrb[0].mxu0 }
  0xe6   : > { %v754_v25 = vmul.f32 %v1806_v23, %v2073_v22  ;;  %v618_v26 = vpop.f32.mrb[1].mxu0 }
  0xe7   : > { %v752_v27 = vmul.f32 %v2073_v22, %v618_v26  ;;  %v1807_v28 = vpop.f32.mrb[2].mxu0  ;;  %v1822_v41 = vpop.f32.mrb[0].mxu1 }
  0xe8   : > { %v793_v29 = vadd.f32 %v2081_v24, %v754_v25  ;;  %v755_v30 = vmul.f32 %v1807_v28, %v2073_v22  ;;  %v621_v31 = vpop.f32.mrb[3].mxu0  ;;  %v770_v45 = vmul.f32 %v1822_v41, %v2073_v22  ;;  %v682_v46 = vpop.f32.mrb[1].mxu1 }
  0xe9   : > { %v791_v32 = vadd.f32 %v2081_v24, %v752_v27  ;;  %v753_v33 = vmul.f32 %v2073_v22, %v621_v31  ;;  %v768_v50 = vmul.f32 %v2073_v22, %v682_v46  ;;  %v1823_v51 = vpop.f32.mrb[2].mxu1 }
  0xea   : > { %v825_v34 = vmax.f32 %v793_v29, 0.0  ;;  %1445 = vst.msk [vmem:[%s2088_s22 + $0x10] sm:$0xff] %vm887_vm2, %v793_v29  ;;  %v794_v35 = vadd.f32 %v2081_v24, %v755_v30  ;;  %v809_v55 = vadd.f32 %v2081_v24, %v770_v45  ;;  %v771_v56 = vmul.f32 %v1823_v51, %v2073_v22  ;;  %v685_v57 = vpop.f32.mrb[3].mxu1 }
  0xeb   : > { %v823_v36 = vmax.f32 %v791_v32, 0.0  ;;  %1443 = vst.msk [vmem:[%s2088_s22] sm:$0xff] %vm887_vm2, %v791_v32  ;;  %v792_v37 = vadd.f32 %v2081_v24, %v753_v33  ;;  %v807_v60 = vadd.f32 %v2081_v24, %v768_v50  ;;  %v769_v61 = vmul.f32 %v2073_v22, %v685_v57 }
  0xec   : > { %1477 = vst.msk [vmem:[%s2097_s24 + $0x10] sm:$0xff] %vm887_vm2, %v825_v34  ;;  %v826_v38 = vmax.f32 %v794_v35, 0.0  ;;  %1446 = vst.msk [vmem:[%s2088_s22 + $0x18] sm:$0xff] %vm887_vm2, %v794_v35  ;;  %v841_v0 = vmax.f32 %v809_v55, 0.0  ;;  %v810_v1 = vadd.f32 %v2081_v24, %v771_v56 }
  0xed   : > { %1475 = vst.msk [vmem:[%s2097_s24] sm:$0xff] %vm887_vm2, %v823_v36  ;;  %v824_v39 = vmax.f32 %v792_v37, 0.0  ;;  %1444 = vst.msk [vmem:[%s2088_s22 + $0x8] sm:$0xff] %vm887_vm2, %v792_v37  ;;  %v1810_v40 = vpop.f32.mrb[4].mxu0  ;;  %v839_v4 = vmax.f32 %v807_v60, 0.0  ;;  %v808_v5 = vadd.f32 %v2081_v24, %v769_v61 }
  0xee   : > { %v856_v42 = vpack.c.bf16 %v826_v38, %v825_v34  ;;  %1478 = vst.msk [vmem:[%s2097_s24 + $0x18] sm:$0xff] %vm887_vm2, %v826_v38  ;;  %v758_v43 = vmul.f32 %v1810_v40, %v2073_v22  ;;  %v634_v44 = vpop.f32.mrb[5].mxu0  ;;  %1461 = vst.msk [vmem:[%s2088_s22 + $0x90] sm:$0xff] %vm887_vm2, %v809_v55  ;;  %v842_v7 = vmax.f32 %v810_v1, 0.0 }
  0xef   : > { %v855_v47 = vpack.c.bf16 %v824_v39, %v823_v36  ;;  %1476 = vst.msk [vmem:[%s2097_s24 + $0x8] sm:$0xff] %vm887_vm2, %v824_v39  ;;  %v756_v48 = vmul.f32 %v2073_v22, %v634_v44  ;;  %v1811_v49 = vpop.f32.mrb[6].mxu0  ;;  %1459 = vst.msk [vmem:[%s2088_s22 + $0x80] sm:$0xff] %vm887_vm2, %v807_v60  ;;  %v840_v10 = vmax.f32 %v808_v5, 0.0  ;;  %v1826_v11 = vpop.f32.mrb[4].mxu1 }
  0xf0   : > { %v797_v52 = vadd.f32 %v2081_v24, %v758_v43  ;;  %v759_v53 = vmul.f32 %v1811_v49, %v2073_v22  ;;  %v637_v54 = vpop.f32.mrb[7].mxu0  ;;  %1493 = vst.msk [vmem:[%s2097_s24 + $0x90] sm:$0xff] %vm887_vm2, %v841_v0  ;;  %1462 = vst.msk [vmem:[%s2088_s22 + $0x98] sm:$0xff] %vm887_vm2, %v810_v1  ;;  %v2164_v15 = vpack.c.bf16 %v842_v7, %v841_v0  ;;  %v698_v17 = vpop.f32.mrb[5].mxu1 }
  0xf1   : > { %v795_v58 = vadd.f32 %v2081_v24, %v756_v48  ;;  %v757_v59 = vmul.f32 %v2073_v22, %v637_v54  ;;  %1840 = vmatprep.mubr.msk.bf16.mxu1 %vm887_vm2, %v855_v47  ;;  %1491 = vst.msk [vmem:[%s2097_s24 + $0x80] sm:$0xff] %vm887_vm2, %v839_v4  ;;  %1460 = vst.msk [vmem:[%s2088_s22 + $0x88] sm:$0xff] %vm887_vm2, %v808_v5  ;;  %v774_v16 = vmul.f32 %v1826_v11, %v2073_v22  ;;  %v1827_v25 = vpop.f32.mrb[6].mxu1 }
  0xf2   : > { %v829_v62 = vmax.f32 %v797_v52, 0.0  ;;  %1449 = vst.msk [vmem:[%s2088_s22 + $0x30] sm:$0xff] %vm887_vm2, %v797_v52  ;;  %v798_v63 = vadd.f32 %v2081_v24, %v759_v53  ;;  %1841 = vmatmul.mubr.msk.bf16.vlgmr.msra.gmra.mrb[16].mxu1 %vm887_vm2, %v856_v42  ;;  %1494 = vst.msk [vmem:[%s2097_s24 + $0x98] sm:$0xff] %vm887_vm2, %v842_v7  ;;  %v2172_v21 = vpack.c.bf16 %v840_v10, %v839_v4  ;;  %v701_v31 = vpop.f32.mrb[7].mxu1 }
  0xf3   : > { %v827_v2 = vmax.f32 %v795_v58, 0.0  ;;  %1447 = vst.msk [vmem:[%s2088_s22 + $0x20] sm:$0xff] %vm887_vm2, %v795_v58  ;;  %v796_v3 = vadd.f32 %v2081_v24, %v757_v59  ;;  %1492 = vst.msk [vmem:[%s2097_s24 + $0x88] sm:$0xff] %vm887_vm2, %v840_v10  ;;  %v772_v23 = vmul.f32 %v2073_v22, %v698_v17  ;;  %v813_v29 = vadd.f32 %v2081_v24, %v774_v16 }
  0xf4   : > { %1481 = vst.msk [vmem:[%s2097_s24 + $0x30] sm:$0xff] %vm887_vm2, %v829_v62  ;;  %v830_v6 = vmax.f32 %v798_v63, 0.0  ;;  %1450 = vst.msk [vmem:[%s2088_s22 + $0x38] sm:$0xff] %vm887_vm2, %v798_v63  ;;  %v775_v30 = vmul.f32 %v1827_v25, %v2073_v22  ;;  %v773_v35 = vmul.f32 %v2073_v22, %v701_v31 }
  0xf5   : > { %1479 = vst.msk [vmem:[%s2097_s24 + $0x20] sm:$0xff] %vm887_vm2, %v827_v2  ;;  %v828_v8 = vmax.f32 %v796_v3, 0.0  ;;  %1448 = vst.msk [vmem:[%s2088_s22 + $0x28] sm:$0xff] %vm887_vm2, %v796_v3  ;;  %v1814_v9 = vpop.f32.mrb[8].mxu0  ;;  %v811_v34 = vadd.f32 %v2081_v24, %v772_v23  ;;  %v845_v38 = vmax.f32 %v813_v29, 0.0 }
  0xf6   : > { %v858_v12 = vpack.c.bf16 %v830_v6, %v829_v62  ;;  %1482 = vst.msk [vmem:[%s2097_s24 + $0x38] sm:$0xff] %vm887_vm2, %v830_v6  ;;  %v762_v13 = vmul.f32 %v1814_v9, %v2073_v22  ;;  %v650_v14 = vpop.f32.mrb[9].mxu0  ;;  %1465 = vst.msk [vmem:[%s2088_s22 + $0xb0] sm:$0xff] %vm887_vm2, %v813_v29  ;;  %v814_v39 = vadd.f32 %v2081_v24, %v775_v30 }
  0xf7   : > { %v857_v18 = vpack.c.bf16 %v828_v8, %v827_v2  ;;  %1480 = vst.msk [vmem:[%s2097_s24 + $0x28] sm:$0xff] %vm887_vm2, %v828_v8  ;;  %v760_v19 = vmul.f32 %v2073_v22, %v650_v14  ;;  %v1815_v20 = vpop.f32.mrb[10].mxu0  ;;  %v843_v42 = vmax.f32 %v811_v34, 0.0  ;;  %1463 = vst.msk [vmem:[%s2088_s22 + $0xa0] sm:$0xff] %vm887_vm2, %v811_v34  ;;  %v812_v43 = vadd.f32 %v2081_v24, %v773_v35  ;;  %v1830_v49 = vpop.f32.mrb[8].mxu1 }
  0xf8   : > { %v801_v26 = vadd.f32 %v2081_v24, %v762_v13  ;;  %v763_v27 = vmul.f32 %v1815_v20, %v2073_v22  ;;  %v653_v28 = vpop.f32.mrb[11].mxu0  ;;  %1497 = vst.msk [vmem:[%s2097_s24 + $0xb0] sm:$0xff] %vm887_vm2, %v845_v38  ;;  %v846_v45 = vmax.f32 %v814_v39, 0.0  ;;  %1466 = vst.msk [vmem:[%s2088_s22 + $0xb8] sm:$0xff] %vm887_vm2, %v814_v39  ;;  %v778_v54 = vmul.f32 %v1830_v49, %v2073_v22  ;;  %v714_v55 = vpop.f32.mrb[9].mxu1 }
  0xf9   : > { %v799_v32 = vadd.f32 %v2081_v24, %v760_v19  ;;  %v761_v33 = vmul.f32 %v2073_v22, %v653_v28  ;;  %1844 = vmatprep.mubr.msk.bf16.mxu1 %vm887_vm2, %v857_v18  ;;  %1495 = vst.msk [vmem:[%s2097_s24 + $0xa0] sm:$0xff] %vm887_vm2, %v843_v42  ;;  %v844_v48 = vmax.f32 %v812_v43, 0.0  ;;  %1464 = vst.msk [vmem:[%s2088_s22 + $0xa8] sm:$0xff] %vm887_vm2, %v812_v43  ;;  %v1831_v61 = vpop.f32.mrb[10].mxu1 }
  0xfa   : > { %v833_v36 = vmax.f32 %v801_v26, 0.0  ;;  %1453 = vst.msk [vmem:[%s2088_s22 + $0x50] sm:$0xff] %vm887_vm2, %v801_v26  ;;  %v802_v37 = vadd.f32 %v2081_v24, %v763_v27  ;;  %1845 = vmatmul.mubr.msk.bf16.gmra.mrb[20].mxu1 %vm887_vm2, %v858_v12  ;;  %v2218_v53 = vpack.c.bf16 %v846_v45, %v845_v38  ;;  %1498 = vst.msk [vmem:[%s2097_s24 + $0xb8] sm:$0xff] %vm887_vm2, %v846_v45  ;;  %v717_v3 = vpop.f32.mrb[11].mxu1 }
  0xfb   : > { %v831_v40 = vmax.f32 %v799_v32, 0.0  ;;  %1451 = vst.msk [vmem:[%s2088_s22 + $0x40] sm:$0xff] %vm887_vm2, %v799_v32  ;;  %v800_v41 = vadd.f32 %v2081_v24, %v761_v33  ;;  %v2226_v59 = vpack.c.bf16 %v844_v48, %v843_v42  ;;  %1496 = vst.msk [vmem:[%s2097_s24 + $0xa8] sm:$0xff] %vm887_vm2, %v844_v48  ;;  %v776_v60 = vmul.f32 %v2073_v22, %v714_v55 }
  0xfc   : > { %1485 = vst.msk [vmem:[%s2097_s24 + $0x50] sm:$0xff] %vm887_vm2, %v833_v36  ;;  %v834_v44 = vmax.f32 %v802_v37, 0.0  ;;  %1454 = vst.msk [vmem:[%s2088_s22 + $0x58] sm:$0xff] %vm887_vm2, %v802_v37  ;;  %v817_v1 = vadd.f32 %v2081_v24, %v778_v54  ;;  %v779_v2 = vmul.f32 %v1831_v61, %v2073_v22  ;;  %v777_v7 = vmul.f32 %v2073_v22, %v717_v3 }
  0xfd   : > { %1483 = vst.msk [vmem:[%s2097_s24 + $0x40] sm:$0xff] %vm887_vm2, %v831_v40  ;;  %v832_v46 = vmax.f32 %v800_v41, 0.0  ;;  %1452 = vst.msk [vmem:[%s2088_s22 + $0x48] sm:$0xff] %vm887_vm2, %v800_v41  ;;  %v1818_v47 = vpop.f32.mrb[12].mxu0  ;;  %v815_v6 = vadd.f32 %v2081_v24, %v776_v60 }
  0xfe   : > { %v860_v50 = vpack.c.bf16 %v834_v44, %v833_v36  ;;  %1486 = vst.msk [vmem:[%s2097_s24 + $0x58] sm:$0xff] %vm887_vm2, %v834_v44  ;;  %v766_v51 = vmul.f32 %v1818_v47, %v2073_v22  ;;  %v666_v52 = vpop.f32.mrb[13].mxu0  ;;  %v849_v10 = vmax.f32 %v817_v1, 0.0  ;;  %1469 = vst.msk [vmem:[%s2088_s22 + $0xd0] sm:$0xff] %vm887_vm2, %v817_v1  ;;  %v818_v11 = vadd.f32 %v2081_v24, %v779_v2 }
  0xff   : > { %v859_v56 = vpack.c.bf16 %v832_v46, %v831_v40  ;;  %1484 = vst.msk [vmem:[%s2097_s24 + $0x48] sm:$0xff] %vm887_vm2, %v832_v46  ;;  %v764_v57 = vmul.f32 %v2073_v22, %v666_v52  ;;  %v1819_v58 = vpop.f32.mrb[14].mxu0  ;;  %v847_v14 = vmax.f32 %v815_v6, 0.0  ;;  %1467 = vst.msk [vmem:[%s2088_s22 + $0xc0] sm:$0xff] %vm887_vm2, %v815_v6  ;;  %v816_v16 = vadd.f32 %v2081_v24, %v777_v7  ;;  %v1834_v23 = vpop.f32.mrb[12].mxu1 }
 0x100   : > { %v805_v62 = vadd.f32 %v2081_v24, %v766_v51  ;;  %v767_v63 = vmul.f32 %v1819_v58, %v2073_v22  ;;  %v669_v0 = vpop.f32.mrb[15].mxu0  ;;  %1501 = vst.msk [vmem:[%s2097_s24 + $0xd0] sm:$0xff] %vm887_vm2, %v849_v10  ;;  %v850_v18 = vmax.f32 %v818_v11, 0.0  ;;  %1470 = vst.msk [vmem:[%s2088_s22 + $0xd8] sm:$0xff] %vm887_vm2, %v818_v11  ;;  %v782_v27 = vmul.f32 %v1834_v23, %v2073_v22  ;;  %v730_v28 = vpop.f32.mrb[13].mxu1 }
 0x101   : > { %v803_v4 = vadd.f32 %v2081_v24, %v764_v57  ;;  %v765_v5 = vmul.f32 %v2073_v22, %v669_v0  ;;  %1848 = vmatprep.mubr.msk.bf16.mxu1 %vm887_vm2, %v859_v56  ;;  %1499 = vst.msk [vmem:[%s2097_s24 + $0xc0] sm:$0xff] %vm887_vm2, %v847_v14  ;;  %v848_v20 = vmax.f32 %v816_v16, 0.0  ;;  %1468 = vst.msk [vmem:[%s2088_s22 + $0xc8] sm:$0xff] %vm887_vm2, %v816_v16  ;;  %v1835_v32 = vpop.f32.mrb[14].mxu1 }
 0x102   : > { %v837_v8 = vmax.f32 %v805_v62, 0.0  ;;  %1457 = vst.msk [vmem:[%s2088_s22 + $0x70] sm:$0xff] %vm887_vm2, %v805_v62  ;;  %v806_v9 = vadd.f32 %v2081_v24, %v767_v63  ;;  %1849 = vmatmul.mubr.msk.bf16.gmra.mrb[24].mxu1 %vm887_vm2, %v860_v50  ;;  %v868_v26 = vpack.c.bf16 %v850_v18, %v849_v10  ;;  %1502 = vst.msk [vmem:[%s2097_s24 + $0xd8] sm:$0xff] %vm887_vm2, %v850_v18  ;;  %v733_v35 = vpop.f32.mrb[15].mxu1 }
 0x103   : > { %v835_v12 = vmax.f32 %v803_v4, 0.0  ;;  %1455 = vst.msk [vmem:[%s2088_s22 + $0x60] sm:$0xff] %vm887_vm2, %v803_v4  ;;  %v804_v13 = vadd.f32 %v2081_v24, %v765_v5  ;;  %v867_v30 = vpack.c.bf16 %v848_v20, %v847_v14  ;;  %1500 = vst.msk [vmem:[%s2097_s24 + $0xc8] sm:$0xff] %vm887_vm2, %v848_v20  ;;  %v780_v31 = vmul.f32 %v2073_v22, %v730_v28 }
 0x104   : > { %1489 = vst.msk [vmem:[%s2097_s24 + $0x70] sm:$0xff] %vm887_vm2, %v837_v8  ;;  %v838_v17 = vmax.f32 %v806_v9, 0.0  ;;  %1458 = vst.msk [vmem:[%s2088_s22 + $0x78] sm:$0xff] %vm887_vm2, %v806_v9  ;;  %v821_v33 = vadd.f32 %v2081_v24, %v782_v27  ;;  %v783_v34 = vmul.f32 %v1835_v32, %v2073_v22  ;;  %v781_v37 = vmul.f32 %v2073_v22, %v733_v35 }
 0x105   : > { %1487 = vst.msk [vmem:[%s2097_s24 + $0x60] sm:$0xff] %vm887_vm2, %v835_v12  ;;  %v836_v19 = vmax.f32 %v804_v13, 0.0  ;;  %1456 = vst.msk [vmem:[%s2088_s22 + $0x68] sm:$0xff] %vm887_vm2, %v804_v13  ;;  %v819_v36 = vadd.f32 %v2081_v24, %v780_v31 }
 0x106   : > { %v862_v25 = vpack.c.bf16 %v838_v17, %v837_v8  ;;  %1490 = vst.msk [vmem:[%s2097_s24 + $0x78] sm:$0xff] %vm887_vm2, %v838_v17  ;;  %v853_v38 = vmax.f32 %v821_v33, 0.0  ;;  %1473 = vst.msk [vmem:[%s2088_s22 + $0xf0] sm:$0xff] %vm887_vm2, %v821_v33  ;;  %v822_v39 = vadd.f32 %v2081_v24, %v783_v34  ;;  %v820_v41 = vadd.f32 %v2081_v24, %v781_v37  ;;  %v2318_v24 = vld [vmem:[%s2520_s5] ss:$0 sm:$0xff] }
 0x107   : > { %v861_v29 = vpack.c.bf16 %v836_v19, %v835_v12  ;;  %1488 = vst.msk [vmem:[%s2097_s24 + $0x68] sm:$0xff] %vm887_vm2, %v836_v19  ;;  %v851_v40 = vmax.f32 %v819_v36, 0.0  ;;  %1471 = vst.msk [vmem:[%s2088_s22 + $0xe0] sm:$0xff] %vm887_vm2, %v819_v36 }
 0x108   : > { %1505 = vst.msk [vmem:[%s2097_s24 + $0xf0] sm:$0xff] %vm887_vm2, %v853_v38  ;;  %v854_v22 = vmax.f32 %v822_v39, 0.0  ;;  %1474 = vst.msk [vmem:[%s2088_s22 + $0xf8] sm:$0xff] %vm887_vm2, %v822_v39  ;;  %v852_v42 = vmax.f32 %v820_v41, 0.0 }
 0x109   : > { %1852 = vmatprep.mubr.msk.bf16.mxu1 %vm887_vm2, %v861_v29  ;;  %1503 = vst.msk [vmem:[%s2097_s24 + $0xe0] sm:$0xff] %vm887_vm2, %v851_v40  ;;  %1472 = vst.msk [vmem:[%s2088_s22 + $0xe8] sm:$0xff] %vm887_vm2, %v820_v41 }
 0x10a   : > { %1853 = vmatmul.mubr.msk.bf16.gmra.mrb[28].mxu1 %vm887_vm2, %v862_v25  ;;  %v870_v43 = vpack.c.bf16 %v854_v22, %v853_v38  ;;  %1506 = vst.msk [vmem:[%s2097_s24 + $0xf8] sm:$0xff] %vm887_vm2, %v854_v22  ;;  %v869_v44 = vpack.c.bf16 %v852_v42, %v851_v40  ;;  %1504 = vst.msk [vmem:[%s2097_s24 + $0xe8] sm:$0xff] %vm887_vm2, %v852_v42 }
 0x10b   : > { %1856 = vmatprep.mubr.msk.bf16.mxu1 %vm887_vm2, %v2172_v21  ;;  %v2323_v21 = vld [vmem:[%s2521_s6] ss:$0 sm:$0xff] }
 0x112   : > { %1857 = vmatmul.mubr.msk.bf16.gmra.mrb[32].mxu1 %vm887_vm2, %v2164_v15 }
 0x113   : > { %1860 = vmatprep.mubr.msk.bf16.mxu1 %vm887_vm2, %v2226_v59 }
 0x11a   : > { %1861 = vmatmul.mubr.msk.bf16.gmra.mrb[36].mxu1 %vm887_vm2, %v2218_v53 }
 0x11b   : > { %1864 = vmatprep.mubr.msk.bf16.mxu1 %vm887_vm2, %v867_v30 }
 0x122   : > { %1865 = vmatmul.mubr.msk.bf16.gmra.mrb[40].mxu1 %vm887_vm2, %v868_v26 }
 0x123   : > { %1868 = vmatprep.mubr.msk.bf16.mxu1 %vm887_vm2, %v869_v44 }
 0x12a   : > { %1869 = vmatmul.mubr.msk.bf16.gmra.mrb[44].mxu1 %vm887_vm2, %v870_v43 }
 0x1c5   : > { %v1842_v15 = vpop.f32.mrb[16].mxu1 }
 0x1c6   : > { %v1106_v45 = vmul.f32 %v1842_v15, %v2318_v24  ;;  %v970_v46 = vpop.f32.mrb[17].mxu1 }
 0x1c7   : > { %v1104_v47 = vmul.f32 %v2318_v24, %v970_v46  ;;  %v1843_v48 = vpop.f32.mrb[18].mxu1 }
 0x1c8   : > { %v1145_v49 = vadd.f32 %v2323_v21, %v1106_v45  ;;  %v1107_v50 = vmul.f32 %v1843_v48, %v2318_v24  ;;  %v973_v51 = vpop.f32.mrb[19].mxu1 }
 0x1c9   : > { %v1143_v52 = vadd.f32 %v2323_v21, %v1104_v47  ;;  %v1105_v53 = vmul.f32 %v2318_v24, %v973_v51 }
 0x1ca   : > { %v1146_v54 = vadd.f32 %v2323_v21, %v1107_v50  ;;  %v1177_v56 = vmax.f32 %v1145_v49, 0.0 }
 0x1cb   : > { %v1144_v55 = vadd.f32 %v2323_v21, %v1105_v53  ;;  %v1175_v58 = vmax.f32 %v1143_v52, 0.0 }
 0x1cc   : > { %v1178_v57 = vmax.f32 %v1146_v54, 0.0 }
 0x1cd   : > { %v1176_v59 = vmax.f32 %v1144_v55, 0.0  ;;  %v1846_v60 = vpop.f32.mrb[20].mxu1 }
 0x1ce   : > { %v1208_v61 = vpack.c.bf16 %v1178_v57, %v1177_v56  ;;  %v1110_v62 = vmul.f32 %v1846_v60, %v2318_v24  ;;  %v986_v63 = vpop.f32.mrb[21].mxu1 }
 0x1cf   : > { %v1207_v0 = vpack.c.bf16 %v1176_v59, %v1175_v58  ;;  %v1108_v1 = vmul.f32 %v2318_v24, %v986_v63  ;;  %v1847_v2 = vpop.f32.mrb[22].mxu1 }
 0x1d0   : > { %v1149_v3 = vadd.f32 %v2323_v21, %v1110_v62  ;;  %v1111_v4 = vmul.f32 %v1847_v2, %v2318_v24  ;;  %v989_v5 = vpop.f32.mrb[23].mxu1 }
 0x1d1   : > { %v1147_v6 = vadd.f32 %v2323_v21, %v1108_v1  ;;  %v1109_v7 = vmul.f32 %v2318_v24, %v989_v5  ;;  %1874 = vmatprep.mubr.msk.bf16.mxu0 %vm531_vm1, %v1207_v0 }
 0x1d2   : > { %v1150_v8 = vadd.f32 %v2323_v21, %v1111_v4  ;;  %1875 = vmatmul.mubr.msk.bf16.vlgmr.msra.gmra.mrb[16].mxu0 %vm531_vm1, %v1208_v61  ;;  %v1181_v10 = vmax.f32 %v1149_v3, 0.0 }
 0x1d3   : > { %v1148_v9 = vadd.f32 %v2323_v21, %v1109_v7  ;;  %v1179_v12 = vmax.f32 %v1147_v6, 0.0 }
 0x1d4   : > { %v1182_v11 = vmax.f32 %v1150_v8, 0.0 }
 0x1d5   : > { %v1180_v13 = vmax.f32 %v1148_v9, 0.0  ;;  %v1850_v14 = vpop.f32.mrb[24].mxu1 }
 0x1d6   : > { %v1210_v16 = vpack.c.bf16 %v1182_v11, %v1181_v10  ;;  %v1114_v17 = vmul.f32 %v1850_v14, %v2318_v24  ;;  %v1002_v18 = vpop.f32.mrb[25].mxu1 }
 0x1d7   : > { %v1209_v19 = vpack.c.bf16 %v1180_v13, %v1179_v12  ;;  %v1112_v20 = vmul.f32 %v2318_v24, %v1002_v18  ;;  %v1851_v23 = vpop.f32.mrb[26].mxu1 }
 0x1d8   : > { %v1153_v25 = vadd.f32 %v2323_v21, %v1114_v17  ;;  %v1115_v26 = vmul.f32 %v1851_v23, %v2318_v24  ;;  %v1005_v27 = vpop.f32.mrb[27].mxu1 }
 0x1d9   : > { %v1151_v28 = vadd.f32 %v2323_v21, %v1112_v20  ;;  %v1113_v29 = vmul.f32 %v2318_v24, %v1005_v27  ;;  %1878 = vmatprep.mubr.msk.bf16.mxu0 %vm531_vm1, %v1209_v19 }
 0x1da   : > { %v1154_v30 = vadd.f32 %v2323_v21, %v1115_v26  ;;  %1879 = vmatmul.mubr.msk.bf16.gmra.mrb[20].mxu0 %vm531_vm1, %v1210_v16  ;;  %v1185_v32 = vmax.f32 %v1153_v25, 0.0 }
 0x1db   : > { %v1152_v31 = vadd.f32 %v2323_v21, %v1113_v29  ;;  %v1183_v34 = vmax.f32 %v1151_v28, 0.0 }
 0x1dc   : > { %v1186_v33 = vmax.f32 %v1154_v30, 0.0 }
 0x1dd   : > { %v1184_v35 = vmax.f32 %v1152_v31, 0.0  ;;  %v1854_v36 = vpop.f32.mrb[28].mxu1 }
 0x1de   : > { %v1212_v37 = vpack.c.bf16 %v1186_v33, %v1185_v32  ;;  %v1118_v38 = vmul.f32 %v1854_v36, %v2318_v24  ;;  %v1018_v39 = vpop.f32.mrb[29].mxu1 }
 0x1df   : > { %v1211_v40 = vpack.c.bf16 %v1184_v35, %v1183_v34  ;;  %v1116_v41 = vmul.f32 %v2318_v24, %v1018_v39  ;;  %v1855_v22 = vpop.f32.mrb[30].mxu1 }
 0x1e0   : > { %v1157_v42 = vadd.f32 %v2323_v21, %v1118_v38  ;;  %v1119_v43 = vmul.f32 %v1855_v22, %v2318_v24  ;;  %v1021_v44 = vpop.f32.mrb[31].mxu1 }
 0x1e1   : > { %v1155_v15 = vadd.f32 %v2323_v21, %v1116_v41  ;;  %v1117_v45 = vmul.f32 %v2318_v24, %v1021_v44  ;;  %1882 = vmatprep.mubr.msk.bf16.mxu0 %vm531_vm1, %v1211_v40 }
 0x1e2   : > { %v1158_v46 = vadd.f32 %v2323_v21, %v1119_v43  ;;  %1883 = vmatmul.mubr.msk.bf16.gmra.mrb[24].mxu0 %vm531_vm1, %v1212_v37  ;;  %v1189_v48 = vmax.f32 %v1157_v42, 0.0 }
 0x1e3   : > { %v1156_v47 = vadd.f32 %v2323_v21, %v1117_v45  ;;  %v1187_v50 = vmax.f32 %v1155_v15, 0.0 }
 0x1e4   : > { %v1190_v49 = vmax.f32 %v1158_v46, 0.0 }
 0x1e5   : > { %v1188_v51 = vmax.f32 %v1156_v47, 0.0  ;;  %v1858_v52 = vpop.f32.mrb[32].mxu1 }
 0x1e6   : > { %v1214_v53 = vpack.c.bf16 %v1190_v49, %v1189_v48  ;;  %v1122_v54 = vmul.f32 %v1858_v52, %v2318_v24  ;;  %v1034_v55 = vpop.f32.mrb[33].mxu1 }
 0x1e7   : > { %v1213_v56 = vpack.c.bf16 %v1188_v51, %v1187_v50  ;;  %v1120_v57 = vmul.f32 %v2318_v24, %v1034_v55  ;;  %v1859_v58 = vpop.f32.mrb[34].mxu1 }
 0x1e8   : > { %v1161_v59 = vadd.f32 %v2323_v21, %v1122_v54  ;;  %v1123_v60 = vmul.f32 %v1859_v58, %v2318_v24  ;;  %v1037_v61 = vpop.f32.mrb[35].mxu1 }
 0x1e9   : > { %v1159_v62 = vadd.f32 %v2323_v21, %v1120_v57  ;;  %v1121_v63 = vmul.f32 %v2318_v24, %v1037_v61  ;;  %1886 = vmatprep.mubr.msk.bf16.mxu0 %vm531_vm1, %v1213_v56 }
 0x1ea   : > { %v1162_v0 = vadd.f32 %v2323_v21, %v1123_v60  ;;  %1887 = vmatmul.mubr.msk.bf16.gmra.mrb[28].mxu0 %vm531_vm1, %v1214_v53  ;;  %v1193_v2 = vmax.f32 %v1161_v59, 0.0 }
 0x1eb   : > { %v1160_v1 = vadd.f32 %v2323_v21, %v1121_v63  ;;  %v1191_v4 = vmax.f32 %v1159_v62, 0.0 }
 0x1ec   : > { %v1194_v3 = vmax.f32 %v1162_v0, 0.0 }
 0x1ed   : > { %v1192_v5 = vmax.f32 %v1160_v1, 0.0  ;;  %v1862_v6 = vpop.f32.mrb[36].mxu1 }
 0x1ee   : > { %v1216_v7 = vpack.c.bf16 %v1194_v3, %v1193_v2  ;;  %v1126_v8 = vmul.f32 %v1862_v6, %v2318_v24  ;;  %v1050_v9 = vpop.f32.mrb[37].mxu1 }
 0x1ef   : > { %v1215_v10 = vpack.c.bf16 %v1192_v5, %v1191_v4  ;;  %v1124_v11 = vmul.f32 %v2318_v24, %v1050_v9  ;;  %v1863_v12 = vpop.f32.mrb[38].mxu1 }
 0x1f0   : > { %v1165_v13 = vadd.f32 %v2323_v21, %v1126_v8  ;;  %v1127_v14 = vmul.f32 %v1863_v12, %v2318_v24  ;;  %v1053_v16 = vpop.f32.mrb[39].mxu1 }
 0x1f1   : > { %v1163_v17 = vadd.f32 %v2323_v21, %v1124_v11  ;;  %v1125_v18 = vmul.f32 %v2318_v24, %v1053_v16  ;;  %1890 = vmatprep.mubr.msk.bf16.mxu0 %vm531_vm1, %v1215_v10 }
 0x1f2   : > { %v1166_v19 = vadd.f32 %v2323_v21, %v1127_v14  ;;  %1891 = vmatmul.mubr.msk.bf16.gmra.mrb[32].mxu0 %vm531_vm1, %v1216_v7  ;;  %v1197_v23 = vmax.f32 %v1165_v13, 0.0 }
 0x1f3   : > { %v1164_v20 = vadd.f32 %v2323_v21, %v1125_v18  ;;  %v1195_v26 = vmax.f32 %v1163_v17, 0.0 }
 0x1f4   : > { %v1198_v25 = vmax.f32 %v1166_v19, 0.0 }
 0x1f5   : > { %v1196_v27 = vmax.f32 %v1164_v20, 0.0  ;;  %v1866_v28 = vpop.f32.mrb[40].mxu1 }
 0x1f6   : > { %v1218_v29 = vpack.c.bf16 %v1198_v25, %v1197_v23  ;;  %v1130_v30 = vmul.f32 %v1866_v28, %v2318_v24  ;;  %v1066_v31 = vpop.f32.mrb[41].mxu1 }
 0x1f7   : > { %v1217_v32 = vpack.c.bf16 %v1196_v27, %v1195_v26  ;;  %v1128_v33 = vmul.f32 %v2318_v24, %v1066_v31  ;;  %v1867_v34 = vpop.f32.mrb[42].mxu1 }
 0x1f8   : > { %v1169_v35 = vadd.f32 %v2323_v21, %v1130_v30  ;;  %v1131_v36 = vmul.f32 %v1867_v34, %v2318_v24  ;;  %v1069_v37 = vpop.f32.mrb[43].mxu1 }
 0x1f9   : > { %v1167_v38 = vadd.f32 %v2323_v21, %v1128_v33  ;;  %v1129_v39 = vmul.f32 %v2318_v24, %v1069_v37  ;;  %1894 = vmatprep.mubr.msk.bf16.mxu0 %vm531_vm1, %v1217_v32 }
 0x1fa   : > { %v1170_v40 = vadd.f32 %v2323_v21, %v1131_v36  ;;  %1895 = vmatmul.mubr.msk.bf16.gmra.mrb[36].mxu0 %vm531_vm1, %v1218_v29  ;;  %v1201_v22 = vmax.f32 %v1169_v35, 0.0 }
 0x1fb   : > { %v1168_v41 = vadd.f32 %v2323_v21, %v1129_v39  ;;  %v1199_v43 = vmax.f32 %v1167_v38, 0.0 }
 0x1fc   : > { %v1202_v42 = vmax.f32 %v1170_v40, 0.0 }
 0x1fd   : > { %v1200_v44 = vmax.f32 %v1168_v41, 0.0  ;;  %v1870_v15 = vpop.f32.mrb[44].mxu1 }
 0x1fe   : > { %v1220_v45 = vpack.c.bf16 %v1202_v42, %v1201_v22  ;;  %v1134_v46 = vmul.f32 %v1870_v15, %v2318_v24  ;;  %v1082_v47 = vpop.f32.mrb[45].mxu1 }
 0x1ff   : > { %v1219_v48 = vpack.c.bf16 %v1200_v44, %v1199_v43  ;;  %v1132_v49 = vmul.f32 %v2318_v24, %v1082_v47  ;;  %v1871_v50 = vpop.f32.mrb[46].mxu1 }
 0x200   : > { %v1173_v51 = vadd.f32 %v2323_v21, %v1134_v46  ;;  %v1135_v52 = vmul.f32 %v1871_v50, %v2318_v24  ;;  %v1085_v53 = vpop.f32.mrb[47].mxu1 }
 0x201   : > { %v1171_v54 = vadd.f32 %v2323_v21, %v1132_v49  ;;  %v1133_v55 = vmul.f32 %v2318_v24, %v1085_v53  ;;  %1898 = vmatprep.mubr.msk.bf16.mxu0 %vm531_vm1, %v1219_v48  ;;  %v2408_v24 = vld [vmem:[%s2523_s8] ss:$0 sm:$0xff] }
 0x202   : > { %v1174_v56 = vadd.f32 %v2323_v21, %v1135_v52  ;;  %1899 = vmatmul.mubr.msk.bf16.gmra.mrb[40].mxu0 %vm531_vm1, %v1220_v45  ;;  %v1205_v58 = vmax.f32 %v1173_v51, 0.0 }
 0x203   : > { %v1172_v57 = vadd.f32 %v2323_v21, %v1133_v55  ;;  %v1203_v60 = vmax.f32 %v1171_v54, 0.0 }
 0x204   : > { %v1206_v59 = vmax.f32 %v1174_v56, 0.0 }
 0x205   : > { %v1204_v61 = vmax.f32 %v1172_v57, 0.0 }
 0x206   : > { %v1222_v62 = vpack.c.bf16 %v1206_v59, %v1205_v58 }
 0x207   : > { %v1221_v63 = vpack.c.bf16 %v1204_v61, %v1203_v60 }
 0x209   : > { %1902 = vmatprep.mubr.msk.bf16.mxu0 %vm531_vm1, %v1221_v63 }
 0x20a   : > { %1903 = vmatmul.mubr.msk.bf16.gmra.mrb[44].mxu0 %vm531_vm1, %v1222_v62 }
 0x2a5   : > { %v1876_v21 = vpop.f32.mrb[16].mxu0 }
 0x2a6   : > { %v1325_v0 = vadd.f32 %v1876_v21, %v2408_v24  ;;  %v1316_v1 = vpop.f32.mrb[17].mxu0 }
 0x2a7   : > { %v1317_v2 = vadd.f32 %v2408_v24, %v1316_v1  ;;  %v1877_v3 = vpop.f32.mrb[18].mxu0 }
 0x2a8   : > { %1510 = vst.msk [vmem:[%s2414_s14 + $0x10] sm:$0xff] %vm1507_vm3, %v1325_v0  ;;  %v1328_v4 = vadd.f32 %v1877_v3, %v2408_v24  ;;  %v1319_v5 = vpop.f32.mrb[19].mxu0 }
 0x2a9   : > { %1508 = vst.msk [vmem:[%s2414_s14] sm:$0xff] %vm1507_vm3, %v1317_v2  ;;  %v1320_v6 = vadd.f32 %v2408_v24, %v1319_v5 }
 0x2aa   : > { %1511 = vst.msk [vmem:[%s2414_s14 + $0x18] sm:$0xff] %vm1507_vm3, %v1328_v4 }
 0x2ab   : > { %1509 = vst.msk [vmem:[%s2414_s14 + $0x8] sm:$0xff] %vm1507_vm3, %v1320_v6 }
 0x2ad   : > { %v1880_v7 = vpop.f32.mrb[20].mxu0 }
 0x2ae   : > { %v1341_v8 = vadd.f32 %v1880_v7, %v2408_v24  ;;  %v1332_v9 = vpop.f32.mrb[21].mxu0 }
 0x2af   : > { %v1333_v10 = vadd.f32 %v2408_v24, %v1332_v9  ;;  %v1881_v11 = vpop.f32.mrb[22].mxu0 }
 0x2b0   : > { %1514 = vst.msk [vmem:[%s2414_s14 + $0x30] sm:$0xff] %vm1507_vm3, %v1341_v8  ;;  %v1344_v12 = vadd.f32 %v1881_v11, %v2408_v24  ;;  %v1335_v13 = vpop.f32.mrb[23].mxu0 }
 0x2b1   : > { %1512 = vst.msk [vmem:[%s2414_s14 + $0x20] sm:$0xff] %vm1507_vm3, %v1333_v10  ;;  %v1336_v14 = vadd.f32 %v2408_v24, %v1335_v13 }
 0x2b2   : > { %1515 = vst.msk [vmem:[%s2414_s14 + $0x38] sm:$0xff] %vm1507_vm3, %v1344_v12 }
 0x2b3   : > { %1513 = vst.msk [vmem:[%s2414_s14 + $0x28] sm:$0xff] %vm1507_vm3, %v1336_v14 }
 0x2b5   : > { %v1884_v16 = vpop.f32.mrb[24].mxu0 }
 0x2b6   : > { %v1357_v17 = vadd.f32 %v1884_v16, %v2408_v24  ;;  %v1348_v18 = vpop.f32.mrb[25].mxu0 }
 0x2b7   : > { %v1349_v19 = vadd.f32 %v2408_v24, %v1348_v18  ;;  %v1885_v20 = vpop.f32.mrb[26].mxu0 }
 0x2b8   : > { %1518 = vst.msk [vmem:[%s2414_s14 + $0x50] sm:$0xff] %vm1507_vm3, %v1357_v17  ;;  %v1360_v23 = vadd.f32 %v1885_v20, %v2408_v24  ;;  %v1351_v25 = vpop.f32.mrb[27].mxu0 }
 0x2b9   : > { %1516 = vst.msk [vmem:[%s2414_s14 + $0x40] sm:$0xff] %vm1507_vm3, %v1349_v19  ;;  %v1352_v26 = vadd.f32 %v2408_v24, %v1351_v25 }
 0x2ba   : > { %1519 = vst.msk [vmem:[%s2414_s14 + $0x58] sm:$0xff] %vm1507_vm3, %v1360_v23 }
 0x2bb   : > { %1517 = vst.msk [vmem:[%s2414_s14 + $0x48] sm:$0xff] %vm1507_vm3, %v1352_v26 }
 0x2bd   : > { %v1888_v27 = vpop.f32.mrb[28].mxu0 }
 0x2be   : > { %v1373_v28 = vadd.f32 %v1888_v27, %v2408_v24  ;;  %v1364_v29 = vpop.f32.mrb[29].mxu0 }
 0x2bf   : > { %v1365_v30 = vadd.f32 %v2408_v24, %v1364_v29  ;;  %v1889_v31 = vpop.f32.mrb[30].mxu0 }
 0x2c0   : > { %1522 = vst.msk [vmem:[%s2414_s14 + $0x70] sm:$0xff] %vm1507_vm3, %v1373_v28  ;;  %v1376_v32 = vadd.f32 %v1889_v31, %v2408_v24  ;;  %v1367_v33 = vpop.f32.mrb[31].mxu0 }
 0x2c1   : > { %1520 = vst.msk [vmem:[%s2414_s14 + $0x60] sm:$0xff] %vm1507_vm3, %v1365_v30  ;;  %v1368_v34 = vadd.f32 %v2408_v24, %v1367_v33 }
 0x2c2   : > { %1523 = vst.msk [vmem:[%s2414_s14 + $0x78] sm:$0xff] %vm1507_vm3, %v1376_v32 }
 0x2c3   : > { %1521 = vst.msk [vmem:[%s2414_s14 + $0x68] sm:$0xff] %vm1507_vm3, %v1368_v34 }
 0x2c5   : > { %v1892_v35 = vpop.f32.mrb[32].mxu0 }
 0x2c6   : > { %v1389_v36 = vadd.f32 %v1892_v35, %v2408_v24  ;;  %v1380_v37 = vpop.f32.mrb[33].mxu0 }
 0x2c7   : > { %v1381_v38 = vadd.f32 %v2408_v24, %v1380_v37  ;;  %v1893_v39 = vpop.f32.mrb[34].mxu0 }
 0x2c8   : > { %1526 = vst.msk [vmem:[%s2414_s14 + $0x90] sm:$0xff] %vm1507_vm3, %v1389_v36  ;;  %v1392_v40 = vadd.f32 %v1893_v39, %v2408_v24  ;;  %v1383_v41 = vpop.f32.mrb[35].mxu0 }
 0x2c9   : > { %1524 = vst.msk [vmem:[%s2414_s14 + $0x80] sm:$0xff] %vm1507_vm3, %v1381_v38  ;;  %v1384_v22 = vadd.f32 %v2408_v24, %v1383_v41 }
 0x2ca   : > { %1527 = vst.msk [vmem:[%s2414_s14 + $0x98] sm:$0xff] %vm1507_vm3, %v1392_v40 }
 0x2cb   : > { %1525 = vst.msk [vmem:[%s2414_s14 + $0x88] sm:$0xff] %vm1507_vm3, %v1384_v22 }
 0x2cd   : > { %v1896_v42 = vpop.f32.mrb[36].mxu0 }
 0x2ce   : > { %v1405_v43 = vadd.f32 %v1896_v42, %v2408_v24  ;;  %v1396_v44 = vpop.f32.mrb[37].mxu0 }
 0x2cf   : > { %v1397_v15 = vadd.f32 %v2408_v24, %v1396_v44  ;;  %v1897_v45 = vpop.f32.mrb[38].mxu0 }
 0x2d0   : > { %1530 = vst.msk [vmem:[%s2414_s14 + $0xb0] sm:$0xff] %vm1507_vm3, %v1405_v43  ;;  %v1408_v46 = vadd.f32 %v1897_v45, %v2408_v24  ;;  %v1399_v47 = vpop.f32.mrb[39].mxu0 }
 0x2d1   : > { %1528 = vst.msk [vmem:[%s2414_s14 + $0xa0] sm:$0xff] %vm1507_vm3, %v1397_v15  ;;  %v1400_v48 = vadd.f32 %v2408_v24, %v1399_v47 }
 0x2d2   : > { %1531 = vst.msk [vmem:[%s2414_s14 + $0xb8] sm:$0xff] %vm1507_vm3, %v1408_v46 }
 0x2d3   : > { %1529 = vst.msk [vmem:[%s2414_s14 + $0xa8] sm:$0xff] %vm1507_vm3, %v1400_v48 }
 0x2d5   : > { %v1900_v49 = vpop.f32.mrb[40].mxu0 }
 0x2d6   : > { %v1421_v50 = vadd.f32 %v1900_v49, %v2408_v24  ;;  %v1412_v51 = vpop.f32.mrb[41].mxu0 }
 0x2d7   : > { %v1413_v52 = vadd.f32 %v2408_v24, %v1412_v51  ;;  %v1901_v53 = vpop.f32.mrb[42].mxu0 }
 0x2d8   : > { %1534 = vst.msk [vmem:[%s2414_s14 + $0xd0] sm:$0xff] %vm1507_vm3, %v1421_v50  ;;  %v1424_v54 = vadd.f32 %v1901_v53, %v2408_v24  ;;  %v1415_v55 = vpop.f32.mrb[43].mxu0 }
 0x2d9   : > { %1532 = vst.msk [vmem:[%s2414_s14 + $0xc0] sm:$0xff] %vm1507_vm3, %v1413_v52  ;;  %v1416_v56 = vadd.f32 %v2408_v24, %v1415_v55 }
 0x2da   : > { %1535 = vst.msk [vmem:[%s2414_s14 + $0xd8] sm:$0xff] %vm1507_vm3, %v1424_v54 }
 0x2db   : > { %1533 = vst.msk [vmem:[%s2414_s14 + $0xc8] sm:$0xff] %vm1507_vm3, %v1416_v56 }
 0x2dd   : > { %v1904_v57 = vpop.f32.mrb[44].mxu0 }
 0x2de   : > { %v1437_v58 = vadd.f32 %v1904_v57, %v2408_v24  ;;  %v1428_v59 = vpop.f32.mrb[45].mxu0 }
 0x2df   : > { %v1429_v60 = vadd.f32 %v2408_v24, %v1428_v59  ;;  %v1905_v61 = vpop.f32.mrb[46].mxu0 }
 0x2e0   : > { %1538 = vst.msk [vmem:[%s2414_s14 + $0xf0] sm:$0xff] %vm1507_vm3, %v1437_v58  ;;  %v1440_v62 = vadd.f32 %v1905_v61, %v2408_v24  ;;  %v1431_v63 = vpop.f32.mrb[47].mxu0 }
 0x2e1   : > { %1536 = vst.msk [vmem:[%s2414_s14 + $0xe0] sm:$0xff] %vm1507_vm3, %v1429_v60  ;;  %v1432_v21 = vadd.f32 %v2408_v24, %v1431_v63 }
 0x2e2   : > { %1539 = vst.msk [vmem:[%s2414_s14 + $0xf8] sm:$0xff] %vm1507_vm3, %v1440_v62 }
 0x2e3   : > { %1537 = vst.msk [vmem:[%s2414_s14 + $0xe8] sm:$0xff] %vm1507_vm3, %v1432_v21 }
 0x2e4 PF: > { %s22_s17 = sadd.s32 1, %s1943_s17  }
 0x2e5   : > { %p19_p4 = scmp.ge.s32.totalorder %s22_s17, 4  }
 0x2e7   :  { %21 = sbr.rel (!%p19_p4) target bundleno = 1 (0x1), region = 110 }

</bundles_post_ra>
